<compile_context>
chip_gen: v7x
topology: tpu7x:2x2x1
jax: 0.10.0
libtpu: 0.0.40
codegen_flags: <defaults>
</compile_context>

<pallas_src>
import math

import jax
import jax.numpy as jnp
from jax.experimental import pallas as pl
from jax.experimental.pallas import tpu as pltpu


def _round_up(v, m):
    return ((v + m - 1) // m) * m


def choose_geometry(n, tiles=None):
    """Pick (n_pad, tm, tk): padded node count + row/contraction tiles."""
    base = _round_up(n, 128)
    if tiles is not None:
        tm, tk = tiles
        step = (tm * tk) // math.gcd(tm, tk)
        return _round_up(n, step), tm, tk
    # ~0.35us per grid step at ~1.4TB/s, expressed in (int8) adjacency bytes.
    step_overhead = 512 * 1024
    best_key, sel = None, None
    for tm in range(128, min(1024, base) + 1, 128):
        for tk in range(128, min(2048, base) + 1, 128):
            step = (tm * tk) // math.gcd(tm, tk)
            n_pad = _round_up(n, step)
            nrt, nkt = n_pad // tm, n_pad // tk
            cost = n_pad * n_pad + nrt * nkt * step_overhead
            if nrt < 2 and base > 128:
                cost = int(cost * 1.5)   # keep >=2 row tiles for v7x dual-TC
            key = (cost, n_pad, -(tm + tk))
            if best_key is None or key < best_key:
                best_key, sel = key, (n_pad, tm, tk)
    return sel


def build_padded_adjacency(edge_index, n, n_pad):
    """Unnormalized int8 adjacency A[dst,src] with add_remaining_self_loops.

    Static across GNN layers / training steps: build once per graph and pass
    via `adj_padded=` to avoid the O(N^2) rebuild on every call.
    Exact for edge multiplicities up to 127.
    """
    src, dst = edge_index[0], edge_index[1]
    adj = jnp.zeros((n_pad, n_pad), jnp.int8)
    adj = adj.at[dst, src].add(jnp.ones(src.shape, jnp.int8))
    diag = jnp.arange(n)
    # Add a self loop only where one is missing (PyG add_remaining_self_loops).
    adj = adj.at[diag, diag].max(jnp.ones((n,), jnp.int8))
    return adj


def _make_conv_kernel(tk, fuse_w, m_resident):
    """Pass 1: H = (A @ M) * dinv [@ W] + b, plus per-row-tile BN partial stats.

    All pl.program_id / pl.num_programs reads happen at the kernel top level
    (never inside pl.when bodies).
    """

    def kernel(a_ref, m_ref, dinv_ref, valid_ref, *rest):
        if fuse_w:
            (w_ref, b_ref, h_ref, psum_ref, pssq_ref, acc_ref) = rest
        else:
            w_ref = None
            (b_ref, h_ref, psum_ref, pssq_ref, acc_ref) = rest

        k = pl.program_id(1)                       # top level only
        is_first = k == 0
        is_last = k == pl.num_programs(1) - 1

        @pl.when(is_first)
        def _():
            acc_ref[...] = jnp.zeros_like(acc_ref)

        # int8 adjacency -> matmul dtype (VPU cast, co-issues with MXU/DMA).
        a = a_ref[...].astype(m_ref.dtype)
        if m_resident:
            m_blk = m_ref[pl.ds(k * tk, tk), :]    # M resident in VMEM
        else:
            m_blk = m_ref[...]                     # M streamed per k tile
        acc_ref[...] += jnp.dot(a, m_blk, preferred_element_type=jnp.float32)

        @pl.when(is_last)
        def _():
            h = acc_ref[...] * dinv_ref[...]       # row scale (D^-1/2)
            if fuse_w:
                h = jnp.dot(h.astype(w_ref.dtype), w_ref[...],
                            preferred_element_type=jnp.float32)
            h = h + b_ref[...]
            h_ref[...] = h.astype(h_ref.dtype)
            hm = h * valid_ref[...]                # mask padded rows from stats
            psum_ref[...] = jnp.broadcast_to(
                jnp.sum(hm, axis=0, keepdims=True), psum_ref.shape)
            pssq_ref[...] = jnp.broadcast_to(
                jnp.sum(hm * hm, axis=0, keepdims=True), pssq_ref.shape)

    return kernel


def _bn_leakyrelu_kernel(h_ref, scale_ref, shift_ref, o_ref):
    """Pass 2: y = h*scale + shift ; leaky_relu(y, 0.01)."""
    y = h_ref[...].astype(jnp.float32) * scale_ref[...] + shift_ref[...]
    o_ref[...] = jnp.where(y >= 0.0, y, 0.01 * y).astype(o_ref.dtype)


def gnn_basic_block(x, edge_index, w, b, gamma, beta, *,
                    matmul_dtype=jnp.bfloat16, eps=1e-5,
                    tiles=None, resident_m=None, adj_padded=None):
    """Forward of GNNBasicBlock. Returns (out, attention_weights=[])."""
    n, c_in = x.shape
    c_out = w.shape[1]

    n_pad, tm, tk = choose_geometry(n, tiles)
    nrt, nkt = n_pad // tm, n_pad // tk
    c_in_pad = _round_up(c_in, 128)
    c_out_pad = _round_up(c_out, 128)

    # ---- O(E)+O(N) glue: degrees with add_remaining_self_loops semantics ----
    src, dst = edge_index[0], edge_index[1]
    ones_e = jnp.ones(src.shape, jnp.float32)
    deg = jnp.zeros((n,), jnp.float32).at[dst].add(ones_e)
    self_cnt = jnp.zeros((n,), jnp.float32).at[dst].add(
        jnp.where(src == dst, 1.0, 0.0))
    deg = deg + jnp.where(self_cnt > 0.0, 0.0, 1.0)        # deg >= 1 always
    dinv = jax.lax.rsqrt(deg)

    # ---- adjacency (int8, integer multiplicities; cache via adj_padded=) ----
    if adj_padded is None:
        adj_padded = build_padded_adjacency(edge_index, n, n_pad)
    assert adj_padded.shape == (n_pad, n_pad) and adj_padded.dtype == jnp.int8

    fuse_w = c_in <= c_out       # contract the smaller channel dim against A
    if fuse_w:
        m = dinv[:, None] * x.astype(jnp.float32)                        # (n, c_in)
        c_mid_pad = c_in_pad
    else:
        m = dinv[:, None] * jnp.dot(x.astype(jnp.float32),
                                    w.astype(jnp.float32))               # (n, c_out)
        c_mid_pad = c_out_pad
    m_pad = jnp.pad(m, ((0, n_pad - n), (0, c_mid_pad - m.shape[1]))
                    ).astype(matmul_dtype)
    dinv_pad = jnp.pad(dinv, (0, n_pad - n)).reshape(n_pad, 1)
    valid = (jnp.arange(n_pad) < n).astype(jnp.float32).reshape(n_pad, 1)
    b_pad = jnp.pad(jnp.reshape(b, (1, -1)).astype(jnp.float32),
                    ((0, 0), (0, c_out_pad - c_out)))

    # Keep M fully VMEM-resident when its double-buffered footprint is small.
    elem = jnp.dtype(matmul_dtype).itemsize
    if resident_m is None:
        resident_m = 2 * n_pad * c_mid_pad * elem <= 6 * 1024 * 1024

    if resident_m:
        m_spec = pl.BlockSpec((n_pad, c_mid_pad), lambda i, k: (0, 0))
    else:
        m_spec = pl.BlockSpec((tk, c_mid_pad), lambda i, k: (k, 0))

    in_specs = [
        pl.BlockSpec((tm, tk), lambda i, k: (i, k)),       # int8 adjacency tile
        m_spec,                                            # prescaled features
        pl.BlockSpec((tm, 1), lambda i, k: (i, 0)),        # D^-1/2 row scale
        pl.BlockSpec((tm, 1), lambda i, k: (i, 0)),        # real-row mask (BN)
    ]
    operands = [adj_padded, m_pad, dinv_pad, valid]
    if fuse_w:
        w_pad = jnp.pad(w.astype(jnp.float32),
                        ((0, c_in_pad - c_in), (0, c_out_pad - c_out))
                        ).astype(matmul_dtype)
        in_specs.append(pl.BlockSpec((c_in_pad, c_out_pad), lambda i, k: (0, 0)))
        operands.append(w_pad)
    in_specs.append(pl.BlockSpec((1, c_out_pad), lambda i, k: (0, 0)))
    operands.append(b_pad)

    h_dtype = matmul_dtype   # bf16 intermediate by default (stats are f32)

    h_pad, psum, pssq = pl.pallas_call(
        _make_conv_kernel(tk, fuse_w, resident_m),
        out_shape=(
            jax.ShapeDtypeStruct((n_pad, c_out_pad), h_dtype),       # conv out
            jax.ShapeDtypeStruct((nrt * 8, c_out_pad), jnp.float32), # tile sums
            jax.ShapeDtypeStruct((nrt * 8, c_out_pad), jnp.float32), # tile sumsq
        ),
        grid=(nrt, nkt),
        in_specs=in_specs,
        out_specs=(
            pl.BlockSpec((tm, c_out_pad), lambda i, k: (i, 0)),
            pl.BlockSpec((8, c_out_pad), lambda i, k: (i, 0)),
            pl.BlockSpec((8, c_out_pad), lambda i, k: (i, 0)),
        ),
        scratch_shapes=[pltpu.VMEM((tm, c_mid_pad), jnp.float32)],
        compiler_params=pltpu.CompilerParams(
            dimension_semantics=("parallel", "arbitrary")),
    )(*operands)

    # ---- tiny O(C) combine of per-row-tile stats into BN scale/shift ----
    total = psum[::8].sum(axis=0)
    total_sq = pssq[::8].sum(axis=0)
    mean = total / n
    # NOTE: E[x^2]-E[x]^2 in f32 can lose precision when |mean| >> std; fine for
    # typical GNN activations.  TODO(synk): compensated/centered variant if needed.
    var = jnp.maximum(total_sq / n - mean * mean, 0.0)     # biased (training) var
    rstd = jax.lax.rsqrt(var + eps)
    gamma_pad = jnp.pad(jnp.reshape(gamma, (-1,)).astype(jnp.float32),
                        (0, c_out_pad - c_out))
    beta_pad = jnp.pad(jnp.reshape(beta, (-1,)).astype(jnp.float32),
                       (0, c_out_pad - c_out))
    scale = (gamma_pad * rstd).reshape(1, c_out_pad)
    shift = (beta_pad - mean * gamma_pad * rstd).reshape(1, c_out_pad)

    # ---- pass 2: BN + LeakyReLU, row tile decoupled from pass 1 ----
    tm2 = tm
    for j in range(1, nrt + 1):
        if nrt % j == 0 and tm * j <= 4096:
            tm2 = tm * j
    out_pad = pl.pallas_call(
        _bn_leakyrelu_kernel,
        out_shape=jax.ShapeDtypeStruct((n_pad, c_out_pad), x.dtype),
        grid=(n_pad // tm2,),
        in_specs=[
            pl.BlockSpec((tm2, c_out_pad), lambda i: (i, 0)),
            pl.BlockSpec((1, c_out_pad), lambda i: (0, 0)),
            pl.BlockSpec((1, c_out_pad), lambda i: (0, 0)),
        ],
        out_specs=pl.BlockSpec((tm2, c_out_pad), lambda i: (i, 0)),
        compiler_params=pltpu.CompilerParams(dimension_semantics=("parallel",)),
    )(h_pad, scale, shift)

    out = out_pad[:n, :c_out]
    attention_weights = []   # GCNConv has no return_attention_weights path
    return out, attention_weights


def _reference(x, edge_index, w, b, gamma, beta):
    """Pure-JAX f32 reference (HIGHEST precision matmuls)."""
    n = x.shape[0]
    hp = jax.lax.Precision.HIGHEST
    adj = jnp.zeros((n, n), jnp.float32).at[edge_index[1], edge_index[0]].add(1.0)
    diag = jnp.arange(n)
    adj = adj.at[diag, diag].max(jnp.ones((n,), jnp.float32))  # remaining self loops
    deg = adj.sum(axis=1)
    dinv = 1.0 / jnp.sqrt(deg)
    a_norm = dinv[:, None] * adj * dinv[None, :]
    h = jnp.dot(a_norm, jnp.dot(x, w, precision=hp), precision=hp) + b.reshape(1, -1)
    mean = jnp.mean(h, axis=0, keepdims=True)
    var = jnp.mean((h - mean) ** 2, axis=0, keepdims=True)
    h = (h - mean) / jnp.sqrt(var + 1e-5) * gamma.reshape(1, -1) + beta.reshape(1, -1)
    return jnp.where(h >= 0, h, 0.01 * h)


def _make_case(key, n, c_in, c_out, e):
    k_x, k_w, k_b, k_g, k_beta, k_e = jax.random.split(key, 6)
    x = jax.random.normal(k_x, (n, c_in), dtype=jnp.float32)
    edge_index = jax.random.randint(k_e, (2, e), 0, n, dtype=jnp.int32)
    w = jax.random.normal(k_w, (c_in, c_out), dtype=jnp.float32) * 0.1
    b = jax.random.normal(k_b, (1, c_out), dtype=jnp.float32) * 0.01
    gamma = 1.0 + 0.1 * jax.random.normal(k_g, (1, c_out), dtype=jnp.float32)
    beta = 0.1 * jax.random.normal(k_beta, (1, c_out), dtype=jnp.float32)
    return x, edge_index, w, b, gamma, beta


if __name__ == "__main__":
    key = jax.random.PRNGKey(0)
    k1, k2, k3 = jax.random.split(key, 3)

    # Tolerances: bf16 MXU inputs + bf16 intermediate H (f32 accumulation and
    # stats); BN normalization amplifies absolute error by ~1/std(h).
    TOL_BF16 = dict(atol=1e-1, rtol=1e-1)
    TOL_F32 = dict(atol=5e-2, rtol=5e-2)

    # Case 1: tiny graph (single tile), fused-W path (c_in <= c_out), bf16 MXU.
    args = _make_case(k1, 16, 8, 16, 32)
    out, attn = gnn_basic_block(*args)
    out = jax.block_until_ready(out)
    ref = _reference(*args)
    assert out.shape == (16, 16)
    assert attn == []
    assert jnp.allclose(out, ref, **TOL_BF16), "bf16 path mismatch"

    # Same case, full-f32 matmul inputs / f32 intermediate.
    out32, _ = gnn_basic_block(*args, matmul_dtype=jnp.float32)
    jax.block_until_ready(out32)
    assert jnp.allclose(out32, ref, **TOL_F32), "f32 path mismatch"

    # Case 2: forced 128x128 tiles -> 3x3 grid (accumulator across k, per-tile
    # BN stats combine); exercised with both resident-M and streaming-M paths.
    args2 = _make_case(k2, 320, 8, 16, 1600)
    ref2 = _reference(*args2)
    out2a, _ = gnn_basic_block(*args2, tiles=(128, 128))
    jax.block_until_ready(out2a)
    assert jnp.allclose(out2a, ref2, **TOL_BF16), "tiled resident-M mismatch"
    out2b, _ = gnn_basic_block(*args2, tiles=(128, 128), resident_m=False)
    jax.block_until_ready(out2b)
    assert jnp.allclose(out2b, ref2, **TOL_BF16), "tiled streaming-M mismatch"

    # Case 3: c_out < c_in -> X@W folded before the A matmul (no in-kernel W).
    args3 = _make_case(k3, 64, 32, 16, 256)
    out3, _ = gnn_basic_block(*args3)
    jax.block_until_ready(out3)
    ref3 = _reference(*args3)
    assert jnp.allclose(out3, ref3, **TOL_BF16), "folded-W path mismatch"

    print("KERNEL_OK")
</pallas_src>

<mosaic_0001>
module attributes {stable_mosaic.version = 11 : i64} {
  func.func @kernel(%arg0: i32, %arg1: i32, %arg2: memref<128x128xi8, #tpu.memory_space<vmem>>, %arg3: memref<128x128xbf16, #tpu.memory_space<vmem>>, %arg4: memref<128x1xf32, #tpu.memory_space<vmem>>, %arg5: memref<128x1xf32, #tpu.memory_space<vmem>>, %arg6: memref<128x128xbf16, #tpu.memory_space<vmem>>, %arg7: memref<1x128xf32, #tpu.memory_space<vmem>>, %arg8: memref<128x128xbf16, #tpu.memory_space<vmem>>, %arg9: memref<8x128xf32, #tpu.memory_space<vmem>>, %arg10: memref<8x128xf32, #tpu.memory_space<vmem>>, %arg11: memref<128x128xf32, #tpu.memory_space<vmem>>) attributes {dimension_semantics = [#tpu.dimension_semantics<parallel>, #tpu.dimension_semantics<arbitrary>], iteration_bounds = array<i64: 1, 1>, scalar_prefetch = 0 : i64, scratch_operands = 1 : i64, tpu.core_type = #tpu.core_type<tc>, window_params = [{transform_indices = @transform_0, window_bounds = array<i64: 128, 128>}, {pipeline_mode = #tpu.pipeline_mode<synchronous>, transform_indices = @transform_1, window_bounds = array<i64: 128, 128>}, {transform_indices = @transform_2, window_bounds = array<i64: 128, 1>}, {transform_indices = @transform_3, window_bounds = array<i64: 128, 1>}, {pipeline_mode = #tpu.pipeline_mode<synchronous>, transform_indices = @transform_4, window_bounds = array<i64: 128, 128>}, {pipeline_mode = #tpu.pipeline_mode<synchronous>, transform_indices = @transform_5, window_bounds = array<i64: 1, 128>}, {transform_indices = @transform_6, window_bounds = array<i64: 128, 128>}, {transform_indices = @transform_7, window_bounds = array<i64: 8, 128>}, {transform_indices = @transform_8, window_bounds = array<i64: 8, 128>}]} {
    %c0_i32 = arith.constant 0 : i32
    %0 = arith.cmpi eq, %arg1, %c0_i32 : i32
    %c0_i32_0 = arith.constant 0 : i32
    %1 = arith.cmpi eq, %arg1, %c0_i32_0 : i32
    %2 = arith.extui %0 : i1 to i32
    %c0_i32_1 = arith.constant 0 : i32
    %3 = arith.cmpi ne, %2, %c0_i32_1 : i32
    scf.if %3 {
      %cst_9 = arith.constant 0.000000e+00 : f32
      %15 = vector.broadcast %cst_9 : f32 to vector<128x128xf32>
      %c0_10 = arith.constant 0 : index
      %c0_11 = arith.constant 0 : index
      %16 = vector.load %arg11[%c0_10, %c0_11] : memref<128x128xf32, #tpu.memory_space<vmem>>, vector<128x128xf32>
      tpu.vector_store %arg11[%c0_10, %c0_11], %15 {strides = array<i32>} : memref<128x128xf32, #tpu.memory_space<vmem>>, vector<128x128xf32>,
    } else {
    }
    %c0 = arith.constant 0 : index
    %c0_2 = arith.constant 0 : index
    %4 = vector.load %arg2[%c0, %c0_2] : memref<128x128xi8, #tpu.memory_space<vmem>>, vector<128x128xi8>
    %5 = arith.sitofp %4 : vector<128x128xi8> to vector<128x128xbf16>
    %c128_i32 = arith.constant 128 : i32
    %6 = arith.muli %arg1, %c128_i32 : i32
    %7 = arith.index_cast %6 : i32 to index
    %c0_3 = arith.constant 0 : index
    %8 = vector.load %arg3[%7, %c0_3] : memref<128x128xbf16, #tpu.memory_space<vmem>>, vector<128x128xbf16>
    %c0_4 = arith.constant 0 : index
    %c0_5 = arith.constant 0 : index
    %9 = vector.load %arg11[%c0_4, %c0_5] : memref<128x128xf32, #tpu.memory_space<vmem>>, vector<128x128xf32>
    %cst = arith.constant dense<0.000000e+00> : vector<128x128xf32>
    %10 = tpu.matmul %5, %8, %cst {dimension_numbers = #tpu.dot_dimension_numbers<[1], [0], [0], [1], [0, 0, 1, 1], [], []>} : vector<128x128xbf16>, vector<128x128xbf16>, vector<128x128xf32> -> vector<128x128xf32>
    %11 = arith.addf %9, %10 : vector<128x128xf32>
    %c0_6 = arith.constant 0 : index
    %c0_7 = arith.constant 0 : index
    %12 = vector.load %arg11[%c0_6, %c0_7] : memref<128x128xf32, #tpu.memory_space<vmem>>, vector<128x128xf32>
    tpu.vector_store %arg11[%c0_6, %c0_7], %11 {strides = array<i32>} : memref<128x128xf32, #tpu.memory_space<vmem>>, vector<128x128xf32>,
    %13 = arith.extui %1 : i1 to i32
    %c0_i32_8 = arith.constant 0 : i32
    %14 = arith.cmpi ne, %13, %c0_i32_8 : i32
    scf.if %14 {
      %c0_9 = arith.constant 0 : index
      %c0_10 = arith.constant 0 : index
      %15 = vector.load %arg11[%c0_9, %c0_10] : memref<128x128xf32, #tpu.memory_space<vmem>>, vector<128x128xf32>
      %c0_11 = arith.constant 0 : index
      %c0_12 = arith.constant 0 : index
      %16 = vector.load %arg4[%c0_11, %c0_12] : memref<128x1xf32, #tpu.memory_space<vmem>>, vector<128x1xf32>
      %17 = vector.broadcast %16 : vector<128x1xf32> to vector<128x128xf32>
      %18 = arith.mulf %15, %17 : vector<128x128xf32>
      %19 = arith.truncf %18 : vector<128x128xf32> to vector<128x128xbf16>
      %c0_13 = arith.constant 0 : index
      %c0_14 = arith.constant 0 : index
      %20 = vector.load %arg6[%c0_13, %c0_14] : memref<128x128xbf16, #tpu.memory_space<vmem>>, vector<128x128xbf16>
      %cst_15 = arith.constant dense<0.000000e+00> : vector<128x128xf32>
      %21 = tpu.matmul %19, %20, %cst_15 {dimension_numbers = #tpu.dot_dimension_numbers<[1], [0], [0], [1], [0, 0, 1, 1], [], []>} : vector<128x128xbf16>, vector<128x128xbf16>, vector<128x128xf32> -> vector<128x128xf32>
      %c0_16 = arith.constant 0 : index
      %c0_17 = arith.constant 0 : index
      %22 = vector.load %arg7[%c0_16, %c0_17] : memref<1x128xf32, #tpu.memory_space<vmem>>, vector<1x128xf32>
      %23 = vector.broadcast %22 : vector<1x128xf32> to vector<128x128xf32>
      %24 = arith.addf %21, %23 : vector<128x128xf32>
      %25 = arith.truncf %24 : vector<128x128xf32> to vector<128x128xbf16>
      %c0_18 = arith.constant 0 : index
      %c0_19 = arith.constant 0 : index
      %26 = vector.load %arg8[%c0_18, %c0_19] : memref<128x128xbf16, #tpu.memory_space<vmem>>, vector<128x128xbf16>
      tpu.vector_store %arg8[%c0_18, %c0_19], %25 {strides = array<i32>} : memref<128x128xbf16, #tpu.memory_space<vmem>>, vector<128x128xbf16>,
      %c0_20 = arith.constant 0 : index
      %c0_21 = arith.constant 0 : index
      %27 = vector.load %arg5[%c0_20, %c0_21] : memref<128x1xf32, #tpu.memory_space<vmem>>, vector<128x1xf32>
      %28 = vector.broadcast %27 : vector<128x1xf32> to vector<128x128xf32>
      %29 = arith.mulf %24, %28 : vector<128x128xf32>
      %cst_22 = arith.constant dense<0.000000e+00> : vector<128xf32>
      %30 = vector.multi_reduction <add>, %29, %cst_22 [0] : vector<128x128xf32> to vector<128xf32>
      %31 = vector.shape_cast %30 : vector<128xf32> to vector<1x128xf32>
      %32 = vector.shape_cast %31 : vector<1x128xf32> to vector<1x128xf32>
      %33 = vector.broadcast %32 : vector<1x128xf32> to vector<8x128xf32>
      %c0_23 = arith.constant 0 : index
      %c0_24 = arith.constant 0 : index
      %34 = vector.load %arg9[%c0_23, %c0_24] : memref<8x128xf32, #tpu.memory_space<vmem>>, vector<8x128xf32>
      tpu.vector_store %arg9[%c0_23, %c0_24], %33 {strides = array<i32>} : memref<8x128xf32, #tpu.memory_space<vmem>>, vector<8x128xf32>,
      %35 = arith.mulf %29, %29 : vector<128x128xf32>
      %cst_25 = arith.constant dense<0.000000e+00> : vector<128xf32>
      %36 = vector.multi_reduction <add>, %35, %cst_25 [0] : vector<128x128xf32> to vector<128xf32>
      %37 = vector.shape_cast %36 : vector<128xf32> to vector<1x128xf32>
      %38 = vector.shape_cast %37 : vector<1x128xf32> to vector<1x128xf32>
      %39 = vector.broadcast %38 : vector<1x128xf32> to vector<8x128xf32>
      %c0_26 = arith.constant 0 : index
      %c0_27 = arith.constant 0 : index
      %40 = vector.load %arg10[%c0_26, %c0_27] : memref<8x128xf32, #tpu.memory_space<vmem>>, vector<8x128xf32>
      tpu.vector_store %arg10[%c0_26, %c0_27], %39 {strides = array<i32>} : memref<8x128xf32, #tpu.memory_space<vmem>>, vector<8x128xf32>,
    } else {
    }
    return
  }
  func.func @transform_0(%arg0: i32, %arg1: i32) -> (i32, i32) {
    %c0_i32 = arith.constant 0 : i32
    return %arg0, %arg1 : i32, i32
  }
  func.func @transform_1(%arg0: i32, %arg1: i32) -> (i32, i32) {
    %c0_i32 = arith.constant 0 : i32
    %c0_i32_0 = arith.constant 0 : i32
    %c0_i32_1 = arith.constant 0 : i32
    return %c0_i32, %c0_i32_0 : i32, i32
  }
  func.func @transform_2(%arg0: i32, %arg1: i32) -> (i32, i32) {
    %c0_i32 = arith.constant 0 : i32
    %c0_i32_0 = arith.constant 0 : i32
    return %arg0, %c0_i32 : i32, i32
  }
  func.func @transform_3(%arg0: i32, %arg1: i32) -> (i32, i32) {
    %c0_i32 = arith.constant 0 : i32
    %c0_i32_0 = arith.constant 0 : i32
    return %arg0, %c0_i32 : i32, i32
  }
  func.func @transform_4(%arg0: i32, %arg1: i32) -> (i32, i32) {
    %c0_i32 = arith.constant 0 : i32
    %c0_i32_0 = arith.constant 0 : i32
    %c0_i32_1 = arith.constant 0 : i32
    return %c0_i32, %c0_i32_0 : i32, i32
  }
  func.func @transform_5(%arg0: i32, %arg1: i32) -> (i32, i32) {
    %c0_i32 = arith.constant 0 : i32
    %c0_i32_0 = arith.constant 0 : i32
    %c0_i32_1 = arith.constant 0 : i32
    return %c0_i32, %c0_i32_0 : i32, i32
  }
  func.func @transform_6(%arg0: i32, %arg1: i32) -> (i32, i32) {
    %c0_i32 = arith.constant 0 : i32
    %c0_i32_0 = arith.constant 0 : i32
    return %arg0, %c0_i32 : i32, i32
  }
  func.func @transform_7(%arg0: i32, %arg1: i32) -> (i32, i32) {
    %c0_i32 = arith.constant 0 : i32
    %c0_i32_0 = arith.constant 0 : i32
    return %arg0, %c0_i32 : i32, i32
  }
  func.func @transform_8(%arg0: i32, %arg1: i32) -> (i32, i32) {
    %c0_i32 = arith.constant 0 : i32
    %c0_i32_0 = arith.constant 0 : i32
    return %arg0, %c0_i32 : i32, i32
  }
}

</mosaic_0001>

<bundles_post_ra>
// kernel: tpu_custom_call.1
= control target key start
LH: loop header
LB: loop body
LE: loop exit
PB: predicated region body
PF: predicated region fallthrough
CT: control target
= control target key end

     0   :  { %14 = vsyncpa [#allocation4], 0  ;;  %v1165_v2 = vmov 0   ;;  %s1436_s0 = inlined_call_operand.vmem [shape: s8[128,128], index: 0, kind: input, shape index: {}]   ;;  %s1437_s1 = inlined_call_operand.vmem [shape: bf16[128,128], index: 1, kind: input, shape index: {}]   ;;  %s1438_s2 = inlined_call_operand.vmem [shape: f32[128,1], index: 2, kind: input, shape index: {}]   ;;  %s1439_s3 = inlined_call_operand.vmem [shape: f32[128,1], index: 3, kind: input, shape index: {}]   ;;  %s1440_s4 = inlined_call_operand.vmem [shape: bf16[128,128], index: 4, kind: input, shape index: {}]   ;;  %s1441_s5 = inlined_call_operand.vmem [shape: f32[1,128], index: 5, kind: input, shape index: {}]   ;;  %s1442_s6 = inlined_call_operand.hbm [shape: bf16[128,128], index: 6, kind: output, shape index: {0}]   ;;  %s1443_s7 = inlined_call_operand.hbm [shape: f32[8,128], index: 7, kind: output, shape index: {1}]   ;;  %s1444_s8 = inlined_call_operand.hbm [shape: f32[8,128], index: 8, kind: output, shape index: {2}]  }
   0x1   :  { %v1079_v0 = vld [vmem:[%s1437_s1] sm:$0xff]   ;;  %v1080_v1 = vld [vmem:[%s1437_s1 + $0x8] sm:$0xff]   ;;  %1077 = vset.pattern.permute.xlu0 %v1165_v2  ;;  %1078 = vset.pattern.permute.xlu1 %v1165_v2  ;;  %v1081_v3 = vld [vmem:[%s1437_s1 + $0x10] sm:$0xff]  }
   0x2   :  { %1007 = vmatprep.subr.bf16.mxu0 %v1079_v0  ;;  %v1082_v4 = vld [vmem:[%s1437_s1 + $0x18] sm:$0xff]   ;;  %v49_v5 = vld [vmem:[%s1436_s0] sm:$0xff]  ;;  %v296_v8 = vld [vmem:[%s1438_s2 + $0x10] sm:$0xff] }
   0x3   :  { %1008 = vmatpush3.bf16.msra.mxu0 %v1079_v0  ;;  %v53_v6 = vunpack.c.l.s8.bf16 %v49_v5  ;;  %v294_v7 = vld [vmem:[%s1438_s2] sm:$0xff]  ;;  %322 = vperm.xlu1 %1078, %v296_v8   ;;  %v295_v9 = vld [vmem:[%s1438_s2 + $0x8] sm:$0xff]  ;;  %v297_v10 = vld [vmem:[%s1438_s2 + $0x18] sm:$0xff] }
   0x4   :  { %1009 = vmatprep.subr.bf16.mxu0 %v1080_v1  ;;  %312 = vperm.xlu0 %1077, %v294_v7   ;;  %v1083_v11 = vld [vmem:[%s1437_s1 + $0x20] sm:$0xff]   ;;  %v299_v13 = vld [vmem:[%s1438_s2 + $0x28] sm:$0xff]  ;;  %v1085_v15 = vld [vmem:[%s1437_s1 + $0x30] sm:$0xff]  }
   0x5   :  { %1023 = vmatprep.mubr.bf16.mxu0 %v53_v6  ;;  %v298_v12 = vld [vmem:[%s1438_s2 + $0x20] sm:$0xff]  ;;  %v1084_v14 = vld [vmem:[%s1437_s1 + $0x28] sm:$0xff]   ;;  %v300_v16 = vld [vmem:[%s1438_s2 + $0x30] sm:$0xff] }
   0x6   :  { %v301_v17 = vld [vmem:[%s1438_s2 + $0x38] sm:$0xff]  ;;  %v302_v18 = vld [vmem:[%s1438_s2 + $0x40] sm:$0xff]  ;;  %v303_v19 = vld [vmem:[%s1438_s2 + $0x48] sm:$0xff] }
   0x7   :  { %1010 = vmatpush3.bf16.msra.mxu0 %v1080_v1  ;;  %327 = vperm.xlu1 %1078, %v297_v10   ;;  %v1086_v20 = vld [vmem:[%s1437_s1 + $0x38] sm:$0xff]  }
   0x8   :  { %1011 = vmatprep.subr.bf16.mxu0 %v1081_v3  ;;  %317 = vperm.xlu0 %1077, %v295_v9  }
   0xb   :  { %1012 = vmatpush3.bf16.msra.mxu0 %v1081_v3  ;;  %337 = vperm.xlu1 %1078, %v299_v13  }
   0xc   :  { %1013 = vmatprep.subr.bf16.mxu0 %v1082_v4  ;;  %332 = vperm.xlu0 %1077, %v298_v12  }
   0xf   :  { %1014 = vmatpush3.bf16.msra.mxu0 %v1082_v4  ;;  %347 = vperm.xlu1 %1078, %v301_v17  }
  0x10   :  { %1015 = vmatprep.subr.bf16.mxu0 %v1083_v11  ;;  %342 = vperm.xlu0 %1077, %v300_v16  }
  0x13   :  { %1016 = vmatpush3.bf16.msra.mxu0 %v1083_v11 }
  0x14   :  { %1017 = vmatprep.subr.bf16.mxu0 %v1084_v14 }
  0x17   :  { %1018 = vmatpush3.bf16.msra.mxu0 %v1084_v14 }
  0x18   :  { %1019 = vmatprep.subr.bf16.mxu0 %v1085_v15 }
  0x19   :  { %15 = vsyncpa [#allocation6], 0  ;;  %352 = vperm.xlu0 %1077, %v302_v18   ;;  %357 = vperm.xlu1 %1078, %v303_v19   ;;  %v304_v21 = vld [vmem:[%s1438_s2 + $0x50] sm:$0xff]  ;;  %v305_v22 = vld [vmem:[%s1438_s2 + $0x58] sm:$0xff]  ;;  %v54_v24 = vunpack.c.h.s8.bf16 %v49_v5 }
  0x1a   :  { %v50_v23 = vld [vmem:[%s1436_s0 + $0x8] sm:$0xff]  ;;  %v306_v26 = vld [vmem:[%s1438_s2 + $0x60] sm:$0xff]  ;;  %v308_v28 = vld [vmem:[%s1438_s2 + $0x70] sm:$0xff] }
  0x1b   :  { %1020 = vmatpush3.bf16.msra.mxu0 %v1085_v15  ;;  %v55_v25 = vunpack.c.l.s8.bf16 %v50_v23  ;;  %v307_v27 = vld [vmem:[%s1438_s2 + $0x68] sm:$0xff]  ;;  %v51_v29 = vld [vmem:[%s1436_s0 + $0x10] sm:$0xff]  ;;  %v309_v30 = vld [vmem:[%s1438_s2 + $0x78] sm:$0xff]  ;;  %v56_v31 = vunpack.c.h.s8.bf16 %v50_v23 }
  0x1c   :  { %1021 = vmatprep.subr.bf16.mxu0 %v1086_v20  ;;  %v57_v32 = vunpack.c.l.s8.bf16 %v51_v29  ;;  %v662_v33 = vld [vmem:[%s1439_s3] sm:$0xff]  ;;  %v663_v34 = vld [vmem:[%s1439_s3 + $0x8] sm:$0xff]  ;;  %v664_v35 = vld [vmem:[%s1439_s3 + $0x10] sm:$0xff]  ;;  %v58_v38 = vunpack.c.h.s8.bf16 %v51_v29 }
  0x1d   :  { %362 = vperm.xlu0 %1077, %v304_v21   ;;  %367 = vperm.xlu1 %1078, %v305_v22   ;;  %v52_v36 = vld [vmem:[%s1436_s0 + $0x18] sm:$0xff]  ;;  %v1087_v39 = vld [vmem:[%s1440_s4] sm:$0xff]   ;;  %v667_v42 = vld [vmem:[%s1439_s3 + $0x28] sm:$0xff] }
  0x1e   :  { %v665_v37 = vld [vmem:[%s1439_s3 + $0x18] sm:$0xff]  ;;  %v59_v40 = vunpack.c.l.s8.bf16 %v52_v36  ;;  %v666_v41 = vld [vmem:[%s1439_s3 + $0x20] sm:$0xff]  ;;  %1039 = vmatprep.subr.bf16.mxu1 %v1087_v39  ;;  %v1088_v43 = vld [vmem:[%s1440_s4 + $0x8] sm:$0xff]   ;;  %v60_v46 = vunpack.c.h.s8.bf16 %v52_v36 }
  0x1f   :  { %1022 = vmatpush3.bf16.msra.mxu0 %v1086_v20  ;;  %1040 = vmatpush3.bf16.msra.mxu1 %v1087_v39  ;;  %v668_v44 = vld [vmem:[%s1439_s3 + $0x30] sm:$0xff]  ;;  %v669_v45 = vld [vmem:[%s1439_s3 + $0x38] sm:$0xff]  ;;  %v670_v48 = vld [vmem:[%s1439_s3 + $0x40] sm:$0xff] }
  0x20   :  { %1041 = vmatprep.subr.bf16.mxu1 %v1088_v43  ;;  %v1089_v47 = vld [vmem:[%s1440_s4 + $0x10] sm:$0xff]   ;;  %v671_v49 = vld [vmem:[%s1439_s3 + $0x48] sm:$0xff]  ;;  %v1090_v50 = vld [vmem:[%s1440_s4 + $0x18] sm:$0xff]  }
  0x21   :  { %372 = vperm.xlu0 %1077, %v306_v26   ;;  %377 = vperm.xlu1 %1078, %v307_v27   ;;  %v672_v51 = vld [vmem:[%s1439_s3 + $0x50] sm:$0xff]  ;;  %v673_v52 = vld [vmem:[%s1439_s3 + $0x58] sm:$0xff]  ;;  %v1091_v53 = vld [vmem:[%s1440_s4 + $0x20] sm:$0xff]  }
  0x22   :  { %1024 = vmatmul.mubr.bf16.vlgmr.msra.gmra.mrb[0].mxu0 %v54_v24  ;;  %v674_v54 = vld [vmem:[%s1439_s3 + $0x60] sm:$0xff]  ;;  %v675_v55 = vld [vmem:[%s1439_s3 + $0x68] sm:$0xff]  ;;  %v676_v57 = vld [vmem:[%s1439_s3 + $0x70] sm:$0xff] }
  0x23   :  { %1027 = vmatprep.mubr.bf16.mxu0 %v55_v25  ;;  %1042 = vmatpush3.bf16.msra.mxu1 %v1088_v43  ;;  %v1092_v56 = vld [vmem:[%s1440_s4 + $0x28] sm:$0xff]   ;;  %v677_v58 = vld [vmem:[%s1439_s3 + $0x78] sm:$0xff]  ;;  %v1093_v59 = vld [vmem:[%s1440_s4 + $0x30] sm:$0xff]  }
  0x24   :  { %1043 = vmatprep.subr.bf16.mxu1 %v1089_v47  ;;  %v1094_v60 = vld [vmem:[%s1440_s4 + $0x38] sm:$0xff]  }
  0x25   :  { %382 = vperm.xlu0 %1077, %v308_v28   ;;  %387 = vperm.xlu1 %1078, %v309_v30  }
  0x27   :  { %1044 = vmatpush3.bf16.msra.mxu1 %v1089_v47 }
  0x28   :  { %1045 = vmatprep.subr.bf16.mxu1 %v1090_v50 }
  0x29   :  { %680 = vperm.xlu0 %1077, %v662_v33   ;;  %685 = vperm.xlu1 %1078, %v663_v34  }
  0x2a   :  { %1028 = vmatmul.mubr.bf16.gmra.mrb[4].mxu0 %v56_v31 }
  0x2b   :  { %1031 = vmatprep.mubr.bf16.mxu0 %v57_v32  ;;  %1046 = vmatpush3.bf16.msra.mxu1 %v1090_v50 }
  0x2c   :  { %1047 = vmatprep.subr.bf16.mxu1 %v1091_v53 }
  0x2d   :  { %690 = vperm.xlu0 %1077, %v664_v35   ;;  %695 = vperm.xlu1 %1078, %v665_v37  }
  0x2f   :  { %1048 = vmatpush3.bf16.msra.mxu1 %v1091_v53 }
  0x30   :  { %1049 = vmatprep.subr.bf16.mxu1 %v1092_v56 }
  0x31   :  { %700 = vperm.xlu0 %1077, %v666_v41   ;;  %705 = vperm.xlu1 %1078, %v667_v42  }
  0x32   :  { %1032 = vmatmul.mubr.bf16.gmra.mrb[8].mxu0 %v58_v38 }
  0x33   :  { %1035 = vmatprep.mubr.bf16.mxu0 %v59_v40  ;;  %1050 = vmatpush3.bf16.msra.mxu1 %v1092_v56 }
  0x34   :  { %1051 = vmatprep.subr.bf16.mxu1 %v1093_v59 }
  0x35   :  { %710 = vperm.xlu0 %1077, %v668_v44   ;;  %715 = vperm.xlu1 %1078, %v669_v45  }
  0x37   :  { %1052 = vmatpush3.bf16.msra.mxu1 %v1093_v59 }
  0x38   :  { %1053 = vmatprep.subr.bf16.mxu1 %v1094_v60 }
  0x39   :  { %720 = vperm.xlu0 %1077, %v670_v48   ;;  %725 = vperm.xlu1 %1078, %v671_v49  }
  0x3a   :  { %1036 = vmatmul.mubr.bf16.gmra.mrb[12].mxu0 %v60_v46 }
  0x3b   :  { %1054 = vmatpush3.bf16.msra.mxu1 %v1094_v60 }
  0x3d   :  { %730 = vperm.xlu0 %1077, %v672_v51   ;;  %735 = vperm.xlu1 %1078, %v673_v52  }
  0x41   :  { %740 = vperm.xlu0 %1077, %v674_v54   ;;  %745 = vperm.xlu1 %1078, %v675_v55  }
  0x45   :  { %750 = vperm.xlu0 %1077, %v676_v57   ;;  %755 = vperm.xlu1 %1078, %v677_v58   ;;  %v1375_v57 = vld [vmem:[%s1441_s5] ss:$0 sm:$0xff]  ;;  %s1166_s5 = smov [#allocation3]  }
  0x46   :  { %s839_s14 = sshll.u32 %s1166_s5, 4  ;;  %s1393_s14 = int_to_ptr.vmem [resolvable:$true] %s839_s14 }
  0x47   :  { %s1095_s15 = scalar_lea.vmem %s1393_s14, 1024  ;;  %p1100_p1 = scmp.lt.s32.totalorder %s1393_s14, %s1393_s14 }
  0x48   :  { %p1096_p0 = scmp.ne.s32.totalorder %s1393_s14, %s1095_s15  ;;  %p1101_p2 = scmp.lt.s32.totalorder %s1095_s15, %s1095_s15 }
  0x4a   :  { %p1102_p3 = por %p1101_p2, %p1100_p1 }
  0x4c   :  { %p1103_p4 = pnand %p1102_p3, %p1096_p0 }
  0x82   :  { %v323_v62 = vpop.permute.xlu1 %322 }
  0x83   :  { %v313_v61 = vpop.permute.xlu0 %312 }
  0x86   :  { %v328_v0 = vpop.permute.xlu1 %327 }
  0x87   :  { %v318_v63 = vpop.permute.xlu0 %317 }
  0x8a   :  { %v338_v2 = vpop.permute.xlu1 %337 }
  0x8b   :  { %v333_v1 = vpop.permute.xlu0 %332 }
  0x8e   :  { %v348_v6 = vpop.permute.xlu1 %347 }
  0x8f   :  { %v343_v4 = vpop.permute.xlu0 %342 }
  0x98   :  { %v353_v15 = vpop.permute.xlu0 %352  ;;  %v358_v16 = vpop.permute.xlu1 %357 }
  0x9c   :  { %v363_v25 = vpop.permute.xlu0 %362  ;;  %v368_v27 = vpop.permute.xlu1 %367 }
  0xa0   :  { %v373_v32 = vpop.permute.xlu0 %372  ;;  %v378_v36 = vpop.permute.xlu1 %377 }
  0xa4   :  { %v383_v42 = vpop.permute.xlu0 %382  ;;  %v388_v44 = vpop.permute.xlu1 %387 }
  0xa8   :  { %v681_v53 = vpop.permute.xlu0 %680  ;;  %v686_v54 = vpop.permute.xlu1 %685 }
  0xac   :  { %v691_v55 = vpop.permute.xlu0 %690  ;;  %v696_v56 = vpop.permute.xlu1 %695 }
  0xb0   :  { %v701_v58 = vpop.permute.xlu0 %700 }
  0xf5   :  { %v1025_v3 = vpop.f32.mrb[0].mxu0 }
  0xf6   :  { %v180_v5 = vpop.f32.mrb[1].mxu0  ;;  %v392_v8 = vmul.f32 %v1025_v3, %v323_v62 }
  0xf7   :  { %v1026_v7 = vpop.f32.mrb[2].mxu0  ;;  %v390_v11 = vmul.f32 %v313_v61, %v180_v5  ;;  %v706_v61 = vpop.permute.xlu1 %705 }
  0xf8   :  { %v393_v9 = vmul.f32 %v1026_v7, %v328_v0  ;;  %v183_v10 = vpop.f32.mrb[3].mxu0 }
  0xf9   :  { %v391_v12 = vmul.f32 %v318_v63, %v183_v10 }
  0xfa   :  { %v407_v13 = vpack.c.bf16 %v393_v9, %v392_v8 }
  0xfb   :  { %v406_v14 = vpack.c.bf16 %v391_v12, %v390_v11  ;;  %v716_v11 = vpop.permute.xlu1 %715 }
  0xfd   :  { %v1029_v17 = vpop.f32.mrb[4].mxu0  ;;  %1055 = vmatprep.mubr.bf16.mxu1 %v406_v14 }
  0xfe   :  { %v196_v18 = vpop.f32.mrb[5].mxu0  ;;  %1056 = vmatmul.mubr.bf16.vlgmr.msra.gmra.mrb[0].mxu1 %v407_v13  ;;  %v396_v20 = vmul.f32 %v1029_v17, %v343_v4 }
  0xff   :  { %v1030_v19 = vpop.f32.mrb[6].mxu0  ;;  %v394_v23 = vmul.f32 %v333_v1, %v196_v18 }
 0x100   :  { %v397_v21 = vmul.f32 %v1030_v19, %v348_v6  ;;  %v199_v22 = vpop.f32.mrb[7].mxu0  ;;  %v711_v6 = vpop.permute.xlu0 %710 }
 0x101   :  { %v395_v24 = vmul.f32 %v338_v2, %v199_v22 }
 0x102   :  { %v409_v26 = vpack.c.bf16 %v397_v21, %v396_v20 }
 0x103   :  { %v408_v28 = vpack.c.bf16 %v395_v24, %v394_v23 }
 0x105   :  { %v1033_v29 = vpop.f32.mrb[8].mxu0  ;;  %1059 = vmatprep.mubr.bf16.mxu1 %v408_v28 }
 0x106   :  { %v212_v30 = vpop.f32.mrb[9].mxu0  ;;  %1060 = vmatmul.mubr.bf16.gmra.mrb[4].mxu1 %v409_v26  ;;  %v400_v33 = vmul.f32 %v1033_v29, %v363_v25  ;;  %v721_v26 = vpop.permute.xlu0 %720 }
 0x107   :  { %v1034_v31 = vpop.f32.mrb[10].mxu0  ;;  %v398_v37 = vmul.f32 %v353_v15, %v212_v30 }
 0x108   :  { %v401_v34 = vmul.f32 %v1034_v31, %v368_v27  ;;  %v215_v35 = vpop.f32.mrb[11].mxu0 }
 0x109   :  { %v399_v38 = vmul.f32 %v358_v16, %v215_v35 }
 0x10a   :  { %v411_v39 = vpack.c.bf16 %v401_v34, %v400_v33 }
 0x10b   :  { %v410_v40 = vpack.c.bf16 %v399_v38, %v398_v37 }
 0x10d   :  { %v1037_v41 = vpop.f32.mrb[12].mxu0  ;;  %1063 = vmatprep.mubr.bf16.mxu1 %v410_v40 }
 0x10e   :  { %v228_v43 = vpop.f32.mrb[13].mxu0  ;;  %1064 = vmatmul.mubr.bf16.gmra.mrb[8].mxu1 %v411_v39  ;;  %v404_v46 = vmul.f32 %v1037_v41, %v383_v42 }
 0x10f   :  { %v1038_v45 = vpop.f32.mrb[14].mxu0  ;;  %v402_v49 = vmul.f32 %v373_v32, %v228_v43  ;;  %v726_v32 = vpop.permute.xlu1 %725 }
 0x110   :  { %v405_v47 = vmul.f32 %v1038_v45, %v388_v44  ;;  %v231_v48 = vpop.f32.mrb[15].mxu0  ;;  %v731_v45 = vpop.permute.xlu0 %730 }
 0x111   :  { %v403_v50 = vmul.f32 %v378_v36, %v231_v48 }
 0x112   :  { %v413_v51 = vpack.c.bf16 %v405_v47, %v404_v46 }
 0x113   :  { %v412_v52 = vpack.c.bf16 %v403_v50, %v402_v49 }
 0x115   :  { %1067 = vmatprep.mubr.bf16.mxu1 %v412_v52 }
 0x116   :  { %1068 = vmatmul.mubr.bf16.gmra.mrb[12].mxu1 %v413_v51 }
 0x1d1   :  { %v1057_v59 = vpop.f32.mrb[0].mxu1 }
 0x1d2   :  { %v519_v60 = vpop.f32.mrb[1].mxu1  ;;  %v528_v62 = vadd.f32 %v1057_v59, %v1375_v57 }
 0x1d3   :  { %v520_v63 = vadd.f32 %v1375_v57, %v519_v60  ;;  %v1058_v0 = vpop.f32.mrb[2].mxu1 }
 0x1d4   :  { %v531_v1 = vadd.f32 %v1058_v0, %v1375_v57  ;;  %v522_v2 = vpop.f32.mrb[3].mxu1  ;;  %v760_v7 = vmul.f32 %v691_v55, %v528_v62 }
 0x1d5   :  { %v758_v3 = vmul.f32 %v681_v53, %v520_v63  ;;  %v523_v4 = vadd.f32 %v1375_v57, %v522_v2 }
 0x1d6   :  { %v936_v5 = vpack.c.bf16 %v531_v1, %v528_v62  ;;  %v761_v10 = vmul.f32 %v696_v56, %v531_v1  ;;  %v798_v17 = vmul.f32 %v760_v7, %v760_v7 }
 0x1d7   :  { %v931_v8 = vpack.c.bf16 %v523_v4, %v520_v63  ;;  %v759_v9 = vmul.f32 %v686_v54, %v523_v4  ;;  %v796_v12 = vmul.f32 %v758_v3, %v758_v3  ;;  %v736_v54 = vpop.permute.xlu1 %735  ;;  %v741_v4 = vpop.permute.xlu0 %740 }
 0x1d8   :  { %968 = vst [vmem:[#allocation3 + $0x8] sm:$0xff] %v936_v5   ;;  %v799_v22 = vmul.f32 %v761_v10, %v761_v10 }
 0x1d9   :  { %932 = vst [vmem:[#allocation3] sm:$0xff] %v931_v8   ;;  %v774_v13 = vadd.f32 %v759_v9, %v758_v3  ;;  %v797_v14 = vmul.f32 %v759_v9, %v759_v9  ;;  %v1061_v15 = vpop.f32.mrb[4].mxu1 }
 0x1da   :  { %v535_v16 = vpop.f32.mrb[5].mxu1  ;;  %v544_v23 = vadd.f32 %v1061_v15, %v1375_v57 }
 0x1db   :  { %v775_v18 = vadd.f32 %v774_v13, %v760_v7  ;;  %v812_v19 = vadd.f32 %v797_v14, %v796_v12  ;;  %v536_v20 = vadd.f32 %v1375_v57, %v535_v16  ;;  %v1062_v21 = vpop.f32.mrb[6].mxu1 }
 0x1dc   :  { %v547_v24 = vadd.f32 %v1062_v21, %v1375_v57  ;;  %v538_v25 = vpop.f32.mrb[7].mxu1  ;;  %v764_v37 = vmul.f32 %v711_v6, %v544_v23 }
 0x1dd   :  { %v813_v27 = vadd.f32 %v812_v19, %v798_v17  ;;  %v762_v28 = vmul.f32 %v701_v58, %v536_v20  ;;  %v776_v29 = vadd.f32 %v775_v18, %v761_v10  ;;  %v539_v30 = vadd.f32 %v1375_v57, %v538_v25 }
 0x1de   :  { %v946_v31 = vpack.c.bf16 %v547_v24, %v544_v23  ;;  %v765_v41 = vmul.f32 %v716_v11, %v547_v24  ;;  %v802_v49 = vmul.f32 %v764_v37, %v764_v37  ;;  %v746_v11 = vpop.permute.xlu1 %745 }
 0x1df   :  { %v777_v33 = vadd.f32 %v776_v29, %v762_v28  ;;  %v800_v34 = vmul.f32 %v762_v28, %v762_v28  ;;  %v814_v35 = vadd.f32 %v813_v27, %v799_v22  ;;  %v941_v36 = vpack.c.bf16 %v539_v30, %v536_v20 }
 0x1e0   :  { %970 = vst [vmem:[#allocation3 + $0x18] sm:$0xff] %v946_v31   ;;  %v763_v38 = vmul.f32 %v706_v61, %v539_v30  ;;  %v803_v58 = vmul.f32 %v765_v41, %v765_v41 }
 0x1e1   :  { %v815_v39 = vadd.f32 %v814_v35, %v800_v34  ;;  %969 = vst [vmem:[#allocation3 + $0x10] sm:$0xff] %v941_v36   ;;  %v1065_v40 = vpop.f32.mrb[8].mxu1 }
 0x1e2   :  { %v778_v42 = vadd.f32 %v777_v33, %v763_v38  ;;  %v801_v43 = vmul.f32 %v763_v38, %v763_v38  ;;  %v551_v44 = vpop.f32.mrb[9].mxu1  ;;  %v560_v46 = vadd.f32 %v1065_v40, %v1375_v57  ;;  %v756_v33 = vpop.permute.xlu1 %755 }
 0x1e3   :  { %v552_v47 = vadd.f32 %v1375_v57, %v551_v44  ;;  %v1066_v48 = vpop.f32.mrb[10].mxu1 }
 0x1e4   :  { %v779_v50 = vadd.f32 %v778_v42, %v764_v37  ;;  %v816_v51 = vadd.f32 %v815_v39, %v801_v43  ;;  %v563_v52 = vadd.f32 %v1066_v48, %v1375_v57  ;;  %v554_v53 = vpop.f32.mrb[11].mxu1  ;;  %v768_v62 = vmul.f32 %v731_v45, %v560_v46 }
 0x1e5   :  { %v766_v55 = vmul.f32 %v721_v26, %v552_v47  ;;  %v555_v56 = vadd.f32 %v1375_v57, %v554_v53  ;;  %v751_v26 = vpop.permute.xlu0 %750 }
 0x1e6   :  { %v817_v59 = vadd.f32 %v816_v51, %v802_v49  ;;  %v780_v60 = vadd.f32 %v779_v50, %v765_v41  ;;  %v956_v61 = vpack.c.bf16 %v563_v52, %v560_v46  ;;  %v769_v8 = vmul.f32 %v736_v54, %v563_v52 }
 0x1e7   :  { %v804_v63 = vmul.f32 %v766_v55, %v766_v55  ;;  %v951_v0 = vpack.c.bf16 %v555_v56, %v552_v47  ;;  %v767_v1 = vmul.f32 %v726_v32, %v555_v56  ;;  %v806_v12 = vmul.f32 %v768_v62, %v768_v62 }
 0x1e8   :  { %v781_v2 = vadd.f32 %v780_v60, %v766_v55  ;;  %v818_v3 = vadd.f32 %v817_v59, %v803_v58  ;;  %972 = vst [vmem:[#allocation3 + $0x28] sm:$0xff] %v956_v61   ;;  %v807_v22 = vmul.f32 %v769_v8, %v769_v8 }
 0x1e9   :  { %971 = vst [vmem:[#allocation3 + $0x20] sm:$0xff] %v951_v0   ;;  %v805_v5 = vmul.f32 %v767_v1, %v767_v1  ;;  %v1069_v6 = vpop.f32.mrb[12].mxu1 }
 0x1ea   :  { %v819_v7 = vadd.f32 %v818_v3, %v804_v63  ;;  %v782_v9 = vadd.f32 %v781_v2, %v767_v1  ;;  %v567_v10 = vpop.f32.mrb[13].mxu1  ;;  %v576_v17 = vadd.f32 %v1069_v6, %v1375_v57 }
 0x1eb   :  { %v568_v13 = vadd.f32 %v1375_v57, %v567_v10  ;;  %v1070_v14 = vpop.f32.mrb[14].mxu1 }
 0x1ec   :  { %v783_v15 = vadd.f32 %v782_v9, %v768_v62  ;;  %v820_v16 = vadd.f32 %v819_v7, %v805_v5  ;;  %v579_v18 = vadd.f32 %v1070_v14, %v1375_v57  ;;  %v570_v19 = vpop.f32.mrb[15].mxu1  ;;  %v772_v30 = vmul.f32 %v751_v26, %v576_v17 }
 0x1ed   :  { %v770_v20 = vmul.f32 %v741_v4, %v568_v13  ;;  %v571_v21 = vadd.f32 %v1375_v57, %v570_v19 }
 0x1ee   :  { %v821_v23 = vadd.f32 %v820_v16, %v806_v12  ;;  %v784_v24 = vadd.f32 %v783_v15, %v769_v8  ;;  %v966_v25 = vpack.c.bf16 %v579_v18, %v576_v17  ;;  %v773_v35 = vmul.f32 %v756_v33, %v579_v18 }
 0x1ef   :  { %v808_v27 = vmul.f32 %v770_v20, %v770_v20  ;;  %v961_v28 = vpack.c.bf16 %v571_v21, %v568_v13  ;;  %v771_v29 = vmul.f32 %v746_v11, %v571_v21 }
 0x1f0   :  { %v785_v31 = vadd.f32 %v784_v24, %v770_v20  ;;  %v822_v32 = vadd.f32 %v821_v23, %v807_v22  ;;  %974 = vst [vmem:[#allocation3 + $0x38] sm:$0xff] %v966_v25  }
 0x1f1   :  { %973 = vst [vmem:[#allocation3 + $0x30] sm:$0xff] %v961_v28   ;;  %v809_v57 = vmul.f32 %v771_v29, %v771_v29 }
 0x1f2   :  { %v823_v34 = vadd.f32 %v822_v32, %v808_v27  ;;  %v786_v36 = vadd.f32 %v785_v31, %v771_v29 }
 0x1f3   :  { %1106 = shalt.err (!%p1103_p4)
}
 0x1f4   :  { %s1107_s18 = scalar_lea.hbm %s1442_s6, 1024 }
 0x1f5   :  { %p1108_p5 = scmp.ne.s32.totalorder %s1442_s6, %s1107_s18  ;;  %p1111_p6 = scmp.lt.u32.totalorder %s1107_s18, %s1442_s6 }
 0x1f7   :  { %p1113_p7 = pnand %p1111_p6, %p1108_p5 }
 0x1f9   :  { %1116 = shalt.err (!%p1113_p7)
}
 0x1fa   :  { %s1167_s22 = smov 64   ;;  %s1168_s23 = smov 4   ;;  %v810_v37 = vmul.f32 %v772_v30, %v772_v30  ;;  %v787_v38 = vadd.f32 %v786_v36, %v772_v30  ;;  %v824_v39 = vadd.f32 %v823_v34, %v809_v57  ;;  %v811_v40 = vmul.f32 %v773_v35, %v773_v35 }
 0x1fb   :  { %845 = dma.vmem_to_hbm [thread:$0]  %s1393_s14, 1024, %s1442_s6, [#allocation4], %s1167_s22, %s1167_s22, %s1168_s23  }
 0x1fc   :  { %v825_v41 = vadd.f32 %v824_v39, %v810_v37  ;;  %v788_v42 = vadd.f32 %v787_v38, %v773_v35  ;;  %s1169_s26 = smov [#allocation5]   ;;  %s1170_s27 = smov [#allocation7]  }
 0x1fd   :  { %s852_s1 = sshll.u32 %s1169_s26, 4  ;;  %s862_s6 = sshll.u32 %s1170_s27, 4  ;;  %s853_s1 = int_to_ptr.vmem [resolvable:$true] %s852_s1  ;;  %s863_s6 = int_to_ptr.vmem [resolvable:$true] %s862_s6 }
 0x1fe   :  { %v789_v43 = vrot.slane %v788_v42, 4  ;;  %v826_v44 = vadd.f32 %v825_v41, %v811_v40  ;;  %s1117_s0 = scalar_lea.vmem %s853_s1, 128  ;;  %p1122_p9 = scmp.lt.s32.totalorder %s853_s1, %s853_s1 }
 0x1ff   :  { %p1118_p8 = scmp.ne.s32.totalorder %s853_s1, %s1117_s0  ;;  %p1123_p10 = scmp.lt.s32.totalorder %s1117_s0, %s1117_s0 }
 0x200   :  { %v790_v45 = vadd.f32 %v789_v43, %v788_v42  ;;  %v827_v46 = vrot.slane %v826_v44, 4 }
 0x201   :  { %p1124_p11 = por %p1123_p10, %p1122_p9 }
 0x202   :  { %v791_v47 = vrot.slane %v790_v45, 2  ;;  %v828_v48 = vadd.f32 %v827_v46, %v826_v44 }
 0x203   :  { %p1125_p12 = pnand %p1124_p11, %p1118_p8 }
 0x204   :  { %v792_v49 = vadd.f32 %v791_v47, %v790_v45  ;;  %v829_v50 = vrot.slane %v828_v48, 2 }
 0x206   :  { %v793_v51 = vrot.slane %v792_v49, 1  ;;  %v830_v52 = vadd.f32 %v829_v50, %v828_v48 }
 0x208   :  { %v794_v53 = vadd.f32 %v793_v51, %v792_v49  ;;  %v831_v54 = vrot.slane %v830_v52, 1 }
 0x20a   :  { %795 = vst [vmem:[#allocation5] sm:$0xff] %v794_v53  ;;  %v832_v55 = vadd.f32 %v831_v54, %v830_v52 }
 0x20b   :  { %1128 = shalt.err (!%p1125_p12)
}
 0x20c   :  { %s1129_s30 = scalar_lea.hbm %s1443_s7, 128 }
 0x20d   :  { %p1130_p13 = scmp.ne.s32.totalorder %s1443_s7, %s1129_s30  ;;  %p1133_p0 = scmp.lt.u32.totalorder %s1129_s30, %s1443_s7 }
 0x20f   :  { %p1135_p1 = pnand %p1133_p0, %p1130_p13 }
 0x211   :  { %1138 = shalt.err (!%p1135_p1)
}
 0x212   :  { %855 = dma.vmem_to_hbm [thread:$0]  %s853_s1, 128, %s1443_s7, [#allocation6]   ;;  %833 = vst [vmem:[#allocation7] sm:$0xff] %v832_v55 }
 0x213   :  { %s1139_s4 = scalar_lea.vmem %s863_s6, 128  ;;  %p1144_p3 = scmp.lt.s32.totalorder %s863_s6, %s863_s6 }
 0x214   :  { %p1140_p2 = scmp.ne.s32.totalorder %s863_s6, %s1139_s4  ;;  %p1145_p4 = scmp.lt.s32.totalorder %s1139_s4, %s1139_s4 }
 0x216   :  { %p1146_p5 = por %p1145_p4, %p1144_p3 }
 0x218   :  { %p1147_p6 = pnand %p1146_p5, %p1140_p2 }
 0x21a   :  { %1150 = shalt.err (!%p1147_p6)
}
 0x21b   :  { %s1151_s15 = scalar_lea.hbm %s1444_s8, 128 }
 0x21c   :  { %p1152_p7 = scmp.ne.s32.totalorder %s1444_s8, %s1151_s15  ;;  %p1155_p8 = scmp.lt.u32.totalorder %s1151_s15, %s1444_s8 }
 0x21e   :  { %p1157_p9 = pnand %p1155_p8, %p1152_p7 }
 0x220   :  { %1160 = shalt.err (!%p1157_p9)
}
 0x221   :  { %865 = dma.vmem_to_hbm [thread:$0]  %s863_s6, 128, %s1444_s8, [#allocation6]  }
 0x222   :  { %1161 = dma.done.wait [#allocation4], 1024  }
 0x223   :  { %1162 = vsyncadd [#allocation4], 4294966272 }
 0x224   :  { %1163 = dma.done.wait [#allocation6], 256  }
 0x225   :  { %1164 = vsyncadd [#allocation6], 4294967040 }
 0x226   :  { %875 = vsyncpa [#allocation4], 1 }
 0x227   :  { %876 = vsyncpa [#allocation6], 1 }

</bundles_post_ra>
